<compile_context>
chip_gen: v5e
topology: v5e:2x2
jax: 0.10.0
libtpu: 0.0.40
codegen_flags: <defaults>
</compile_context>

<pallas_src>
import functools

import jax
import jax.numpy as jnp
from jax.experimental import pallas as pl
from jax.experimental.pallas import tpu as pltpu


def _swish_kernel(x_ref, o_ref, *, bf16_math: bool):
    """out = x * sigmoid(x); sigmoid = 0.5*tanh(0.5*x) + 0.5 (one EUP op/elem)."""
    x = x_ref[...]
    if bf16_math and x.dtype == jnp.bfloat16:
        # v6e/v7x: bf16-native EUP/VPU — half the transcendental width and
        # half the vreg live-range of the f32 path.
        sig = 0.5 * jnp.tanh(0.5 * x) + 0.5      # weak-typed consts stay bf16
        o_ref[...] = x * sig
    else:
        xf = x.astype(jnp.float32)
        sig = 0.5 * jnp.tanh(0.5 * xf) + 0.5     # exact sigmoid
        o_ref[...] = (xf * sig).astype(o_ref.dtype)


_LANE_CANDIDATES = (4096, 2048, 1024, 512, 256, 128)


def _chip_config():
    """Returns (target_block_bytes, vmem_limit_bytes, two_tensorcores, bf16_eup)."""
    kind = ""
    try:
        kind = jax.devices()[0].device_kind.lower()
    except Exception:
        pass
    if "v7" in kind:
        # 64 MiB VMEM/TC, 3.2 TB/s HBM: big blocks to amortize per-step cost;
        # 4 x 8 MiB buffers needs the scoped limit raised above 32 MiB.
        return 8 << 20, 40 << 20, True, True
    if "v6" in kind:
        # 128 MiB VMEM, 1.4 TB/s HBM: ~4 MiB blocks hit the throughput plateau.
        return 4 << 20, 32 << 20, False, True
    # v5e / unknown: conservative (16 MiB scoped default, no bf16 EUP/VPU).
    return 2 << 20, 16 << 20, False, False


def swish(x: jax.Array, *, donate: bool = False) -> jax.Array:
    """Elementwise x * sigmoid(x); preserves shape & dtype (torch Swish semantics).

    donate=True aliases the input buffer as the output (only pass this when x
    is actually donated / dead after the call — it clobbers the input).
    """
    orig_shape = x.shape
    orig_dtype = x.dtype
    n = x.size
    if n == 0:
        return x

    target_block_bytes, vmem_limit, two_tc, bf16_eup = _chip_config()
    itemsize = jnp.dtype(orig_dtype).itemsize
    flat = x.reshape(-1)

    # Ragged tail (<128 elems) is handled in plain JAX so the common, aligned
    # path never pays a full-tensor pad/slice pass.
    rem = n % 128
    n_main = n - rem
    if n_main == 0:
        xf = flat.astype(jnp.float32)
        return (xf * jax.nn.sigmoid(xf)).astype(orig_dtype).reshape(orig_shape)
    main = flat[:n_main] if rem else flat

    # Widest lane-dense slab width that divides the aligned element count.
    lane = next(c for c in _LANE_CANDIDATES if n_main % c == 0)
    rows = n_main // lane
    x2d = main.reshape(rows, lane)

    # Sublane packing multiple: f32 -> 8, bf16/f16 -> 16, int8/fp8 -> 32 rows.
    sub = {4: 8, 2: 16, 1: 32}.get(itemsize, 8)
    bytes_per_row = lane * itemsize
    target_rows = max(sub, (target_block_bytes // bytes_per_row) // sub * sub)
    block_rows = min(rows, target_rows)

    # v7x only: force >=2 grid steps so the "parallel" axis shards across both
    # TensorCores (single-block tensors would otherwise use half the chip).
    if two_tc and rows > sub and block_rows >= rows:
        block_rows = ((pl.cdiv(rows, 2) + sub - 1) // sub) * sub

    grid = (pl.cdiv(rows, block_rows),)

    cost = pl.CostEstimate(
        flops=4 * n_main,
        transcendentals=n_main,
        bytes_accessed=2 * n_main * itemsize,
    )

    out2d = pl.pallas_call(
        functools.partial(_swish_kernel, bf16_math=bf16_eup),
        out_shape=jax.ShapeDtypeStruct((rows, lane), orig_dtype),
        grid_spec=pltpu.PrefetchScalarGridSpec(
            num_scalar_prefetch=0,
            grid=grid,
            in_specs=[pl.BlockSpec((block_rows, lane), lambda i: (i, 0))],
            out_specs=pl.BlockSpec((block_rows, lane), lambda i: (i, 0)),
        ),
        compiler_params=pltpu.CompilerParams(
            dimension_semantics=("parallel",),
            vmem_limit_bytes=vmem_limit,
        ),
        cost_estimate=cost,
        input_output_aliases=({0: 0} if donate else {}),
    )(x2d)

    out_flat = out2d.reshape(-1)
    if rem:
        tail = flat[n_main:].astype(jnp.float32)
        tail_out = (tail * jax.nn.sigmoid(tail)).astype(orig_dtype)
        out_flat = jnp.concatenate([out_flat, tail_out])
    return out_flat.reshape(orig_shape)


if __name__ == "__main__":
    key = jax.random.PRNGKey(0)
    # NCHW input consistent with a conv-style module: batch=2, channels=4, 16x16.
    x = jax.random.normal(key, (2, 4, 16, 16), dtype=jnp.float32)

    y = swish(x)
    jax.block_until_ready(y)

    # Correctness check against pure-JAX reference (exact sigmoid — the kernel
    # uses the mathematically identical tanh formulation, no approx ops).
    y_ref = x * jax.nn.sigmoid(x)
    assert y.shape == x.shape and y.dtype == x.dtype
    assert jnp.allclose(y, y_ref, atol=1e-5, rtol=1e-5)

    print("KERNEL_OK")
</pallas_src>

<mosaic_0001>
module attributes {stable_mosaic.version = 11 : i64} {
  func.func @_swish_kernel(%arg0: i32, %arg1: memref<1x2048xf32, #tpu.memory_space<vmem>>, %arg2: memref<1x2048xf32, #tpu.memory_space<vmem>>) attributes {dimension_semantics = [#tpu.dimension_semantics<parallel>], iteration_bounds = array<i64: 1>, scalar_prefetch = 0 : i64, scratch_operands = 0 : i64, tpu.core_type = #tpu.core_type<tc>, window_params = [{transform_indices = @transform_0, window_bounds = array<i64: 1, 2048>}, {transform_indices = @transform_1, window_bounds = array<i64: 1, 2048>}]} {
    %c0 = arith.constant 0 : index
    %c0_0 = arith.constant 0 : index
    %0 = vector.load %arg1[%c0, %c0_0] : memref<1x2048xf32, #tpu.memory_space<vmem>>, vector<1x2048xf32>
    %cst = arith.constant 5.000000e-01 : f32
    %1 = vector.broadcast %cst : f32 to vector<1x2048xf32>
    %2 = arith.mulf %1, %0 : vector<1x2048xf32>
    %3 = math.tanh %2 : vector<1x2048xf32>
    %cst_1 = arith.constant 5.000000e-01 : f32
    %4 = vector.broadcast %cst_1 : f32 to vector<1x2048xf32>
    %5 = arith.mulf %4, %3 : vector<1x2048xf32>
    %cst_2 = arith.constant 5.000000e-01 : f32
    %6 = vector.broadcast %cst_2 : f32 to vector<1x2048xf32>
    %7 = arith.addf %5, %6 : vector<1x2048xf32>
    %8 = arith.mulf %0, %7 : vector<1x2048xf32>
    %c0_3 = arith.constant 0 : index
    %c0_4 = arith.constant 0 : index
    %9 = vector.load %arg2[%c0_3, %c0_4] : memref<1x2048xf32, #tpu.memory_space<vmem>>, vector<1x2048xf32>
    tpu.vector_store %arg2[%c0_3, %c0_4], %8 {strides = array<i32>} : memref<1x2048xf32, #tpu.memory_space<vmem>>, vector<1x2048xf32>,
    return
  }
  func.func @transform_0(%arg0: i32) -> (i32, i32) {
    %c0_i32 = arith.constant 0 : i32
    %c0_i32_0 = arith.constant 0 : i32
    return %arg0, %c0_i32 : i32, i32
  }
  func.func @transform_1(%arg0: i32) -> (i32, i32) {
    %c0_i32 = arith.constant 0 : i32
    %c0_i32_0 = arith.constant 0 : i32
    return %arg0, %c0_i32 : i32, i32
  }
}

</mosaic_0001>

<bundles_post_ra>
// kernel: tpu_custom_call.1
= control target key start
LH: loop header
LB: loop body
LE: loop exit
PB: predicated region body
PF: predicated region fallthrough
CT: control target
= control target key end

     0   :  { %6 = vsyncpa [#allocation3], 0  ;;  %s130_s0 = inlined_call_operand.hbm [shape: f32[1,2048], index: 0, kind: input, shape index: {}]   ;;  %s131_s1 = inlined_call_operand.hbm [shape: f32[1,2048], index: 1, kind: output, shape index: {}]  }
   0x1   :  { %7 = vsyncpa [#allocation4], 0  ;;  %s13_s8 = sshll.u32 %s130_s0, 4  ;;  %s112_s9 = smov [#allocation2]   ;;  %s14_s8 = int_to_ptr.hbm [resolvable:$true] %s13_s8 }
   0x2   :  { %s15_s10 = sshll.u32 %s112_s9, 4  ;;  %s16_s10 = int_to_ptr.vmem [resolvable:$true] %s15_s10 }
   0x3   :  { %18 = dma.hbm_to_vmem [thread:$0]  %s14_s8, 256, %s16_s10, [#allocation3]  }
   0x4   :  { %108 = dma.done.wait [#allocation3], 256  }
   0x5   :  { %109 = vsyncadd [#allocation3], 4294967040  ;;  %v23_v0 = vld [vmem:[#allocation2] sm:$0xff]  ;;  %v24_v1 = vld [vmem:[#allocation2 + $0x8] sm:$0xff]  ;;  %s113_s11 = smov [#allocation5]   ;;  %s44_s14 = sshll.u32 %s131_s1, 4  ;;  %s45_s14 = int_to_ptr.hbm [resolvable:$true] %s44_s14 }
   0x6   :  { %v25_v2 = vmul.f32 0.5, %v23_v0  ;;  %v26_v3 = vmul.f32 0.5, %v24_v1  ;;  %s42_s0 = sshll.u32 %s113_s11, 4  ;;  %s43_s0 = int_to_ptr.vmem [resolvable:$true] %s42_s0 }
   0x8   :  { %56 = vtanh.f32 %v25_v2 }
   0x9   :  { %58 = vtanh.f32 %v26_v3 }
   0xe   :  { %v57_v4 = vpop.eup %56 }
   0xf   :  { %v59_v5 = vpop.eup %58  ;;  %v29_v6 = vmul.f32 0.5, %v57_v4 }
  0x10   :  { %v30_v7 = vmul.f32 0.5, %v59_v5 }
  0x11   :  { %v31_v8 = vadd.f32 0.5, %v29_v6 }
  0x12   :  { %v32_v9 = vadd.f32 0.5, %v30_v7 }
  0x13   :  { %v33_v10 = vmul.f32 %v31_v8, %v23_v0 }
  0x14   :  { %v34_v11 = vmul.f32 %v32_v9, %v24_v1 }
  0x15   :  { %35 = vst [vmem:[#allocation5] sm:$0xff] %v33_v10 }
  0x16   :  { %36 = vst [vmem:[#allocation5 + $0x8] sm:$0xff] %v34_v11 }
  0x17   :  { %47 = dma.vmem_to_hbm [thread:$0]  %s43_s0, 256, %s45_s14, [#allocation4]  }
  0x18   :  { %110 = dma.done.wait [#allocation4], 256  }
  0x19   :  { %111 = vsyncadd [#allocation4], 4294967040 }
  0x1a   :  { %52 = vsyncpa [#allocation3], 1 }
  0x1b   :  { %53 = vsyncpa [#allocation4], 1 }

</bundles_post_ra>
